<compile_context>
chip_gen: v7x
topology: tpu7x:2x2x1
jax: 0.10.0
libtpu: 0.0.40
codegen_flags: <defaults>
</compile_context>

<pallas_src>
import jax
import jax.numpy as jnp
from jax.experimental import pallas as pl
from jax.experimental.pallas import tpu as pltpu


def _depthwise_pointwise(x, xp_ref, wdw, wpw, W, pad):
    """Fused depthwise 3x3 (stride 1, SAME) + pointwise 1x1 on one image.

    x      : (C, H*W) f32, spatial dims fused on the lane axis.
    xp_ref : (C, pad + H*W + pad) VMEM scratch used as a zero-padded copy so
             every tap is a plain lane-offset ref load.
    wdw    : (9, C, 1) depthwise taps (kh*3 + kw major).
    wpw    : (O, C)    pointwise weights.
    returns: (O, H*W) f32 (pre-BN pointwise output).
    """
    C, HW = x.shape

    # Zero-padded copy: the zero margins realise the H-edge padding, because a
    # row over/under-run lands outside [0, H*W) in the fused spatial index.
    xp_ref[...] = jnp.zeros_like(xp_ref)
    xp_ref[:, pad:pad + HW] = x               # lane-aligned interior store

    # Column masks for the W edges: a +/-1 column shift must not pull data
    # across a row boundary.  (Built once, reused by 6 of the 9 taps.)
    col = jax.lax.broadcasted_iota(jnp.int32, (1, HW), dimension=1) % W
    col_ok = {-1: col >= 1, 0: None, 1: col <= W - 2}

    acc = None
    for kh in range(3):
        for kw in range(3):
            dh, dw = kh - 1, kw - 1
            # Lane-shifted window as a ref load (pltpu.roll on the XLU is an
            # alternative; the offset load keeps the semantics explicit).
            tap = xp_ref[:, pl.ds(pad + dh * W + dw, HW)]         # (C, HW)
            if col_ok[dw] is not None:
                tap = jnp.where(col_ok[dw], tap, 0.0)
            term = tap * wdw[kh * 3 + kw]                         # (C,HW)*(C,1)
            acc = term if acc is None else acc + term             # 1st tap inits

    # Pointwise 1x1 as C broadcast multiply-accumulates on the VPU
    # (C and O are far below the MXU tile; no jnp.dot).
    z = None
    for c in range(C):
        contrib = wpw[:, c:c + 1] * acc[c:c + 1, :]               # (O,1)*(1,HW)
        z = contrib if z is None else z + contrib
    return z                                                      # (O, HW)


def depthwise_separable_conv(x_nchw, w_dw, w_pw, gamma, beta,
                             *, use_residual=True, eps=1e-5):
    """x: (N,C,H,W); w_dw: (C,1,3,3); w_pw: (O,C,1,1); gamma/beta: (O,)."""
    N, C, H, W = x_nchw.shape
    O = w_pw.shape[0]
    if use_residual:
        assert O == C, "residual path requires out_channels == in_channels"
    HW = H * W
    assert HW % 128 == 0, "H*W must be a multiple of 128 for the lane-dense layout"
    # TODO(synk): only the stride=1 configuration of the module is implemented
    # (the default, and the only one compatible with use_residual=True).
    pad = pl.cdiv(W + 1, 128) * 128        # lane-aligned halo on the fused axis

    # ---- glue: lane-dense layout (pure reshape) + weight packing ----
    x_flat = x_nchw.reshape(N, C, HW).astype(jnp.float32)                 # (N,C,HW)
    wdw = jnp.transpose(w_dw[:, 0, :, :], (1, 2, 0)).reshape(9, C, 1).astype(jnp.float32)
    wpw = w_pw[:, :, 0, 0].astype(jnp.float32)                            # (O, C)

    x_spec = pl.BlockSpec((1, C, HW), lambda n: (n, 0, 0))
    wdw_spec = pl.BlockSpec((9, C, 1), lambda n: (0, 0, 0))
    wpw_spec = pl.BlockSpec((O, C), lambda n: (0, 0))
    scratch = [pltpu.VMEM((C, pad + HW + pad), jnp.float32)]
    cparams = pltpu.CompilerParams(
        dimension_semantics=("parallel",),          # megacore-shardable on v7x
        vmem_limit_bytes=32 * 1024 * 1024)          # fits every generation (v7x: 64 MiB phys)

    # ---- pass 1: per-image, per-channel sum & sum-of-squares of z ----
    def stats_kernel(x_ref, wdw_ref, wpw_ref, sum_ref, ssq_ref, xp_ref):
        z = _depthwise_pointwise(x_ref[0], xp_ref, wdw_ref[...], wpw_ref[...], W, pad)
        sum_ref[0] = jnp.sum(z, axis=1, keepdims=True)          # (O, 1)
        ssq_ref[0] = jnp.sum(z * z, axis=1, keepdims=True)      # (O, 1)

    psum, pssq = pl.pallas_call(
        stats_kernel,
        out_shape=(jax.ShapeDtypeStruct((N, O, 1), jnp.float32),
                   jax.ShapeDtypeStruct((N, O, 1), jnp.float32)),
        grid=(N,),
        in_specs=[x_spec, wdw_spec, wpw_spec],
        out_specs=(pl.BlockSpec((1, O, 1), lambda n: (n, 0, 0)),
                   pl.BlockSpec((1, O, 1), lambda n: (n, 0, 0))),
        scratch_shapes=scratch,
        compiler_params=cparams,
    )(x_flat, wdw, wpw)

    # ---- glue: fold batch stats + gamma/beta into per-channel scale & shift ----
    count = float(N * HW)
    mean = jnp.sum(psum, axis=0) / count                               # (O, 1)
    var = jnp.maximum(jnp.sum(pssq, axis=0) / count - mean * mean, 0.0)
    scale = gamma.reshape(O, 1).astype(jnp.float32) * jax.lax.rsqrt(var + eps)
    shift = beta.reshape(O, 1).astype(jnp.float32) - mean * scale

    # ---- pass 2: recompute convs, normalise (z*scale+shift), ReLU, residual ----
    def apply_kernel(x_ref, wdw_ref, wpw_ref, scale_ref, shift_ref, o_ref, xp_ref):
        x = x_ref[0]                                                   # (C, HW)
        z = _depthwise_pointwise(x, xp_ref, wdw_ref[...], wpw_ref[...], W, pad)
        z = jnp.maximum(z * scale_ref[...] + shift_ref[...], 0.0)
        if use_residual:
            z = z + x
        o_ref[0] = z                                   # lane-dense (O, HW) store

    out_flat = pl.pallas_call(
        apply_kernel,
        out_shape=jax.ShapeDtypeStruct((N, O, HW), jnp.float32),
        grid=(N,),
        in_specs=[x_spec, wdw_spec, wpw_spec,
                  pl.BlockSpec((O, 1), lambda n: (0, 0)),
                  pl.BlockSpec((O, 1), lambda n: (0, 0))],
        out_specs=pl.BlockSpec((1, O, HW), lambda n: (n, 0, 0)),
        scratch_shapes=scratch,
        compiler_params=cparams,
    )(x_flat, wdw, wpw, scale, shift)

    return out_flat.reshape(N, O, H, W)


def reference(x, w_dw, w_pw, gamma, beta, *, use_residual=True, eps=1e-5):
    """Pure-JAX reference matching the PyTorch forward (training-mode BN)."""
    C = x.shape[1]
    dw = jax.lax.conv_general_dilated(
        x, w_dw, (1, 1), ((1, 1), (1, 1)),
        dimension_numbers=("NCHW", "OIHW", "NCHW"), feature_group_count=C)
    pw = jax.lax.conv_general_dilated(
        dw, w_pw, (1, 1), ((0, 0), (0, 0)),
        dimension_numbers=("NCHW", "OIHW", "NCHW"))
    mean = pw.mean(axis=(0, 2, 3), keepdims=True)
    var = ((pw - mean) ** 2).mean(axis=(0, 2, 3), keepdims=True)
    z = (pw - mean) * jax.lax.rsqrt(var + eps)
    z = z * gamma.reshape(1, -1, 1, 1) + beta.reshape(1, -1, 1, 1)
    z = jnp.maximum(z, 0.0)
    return z + x if use_residual else z


if __name__ == "__main__":
    # Small shapes consistent with the module; residual requires in==out, stride=1.
    N, C, H, W = 2, 4, 16, 16
    O = C
    key = jax.random.PRNGKey(0)
    kx, kd, kp = jax.random.split(key, 3)

    x = jax.random.normal(kx, (N, C, H, W), jnp.float32)
    # Deterministic synthetic parameters (shapes from nn.Conv2d / nn.BatchNorm2d).
    w_dw = 0.3 * jax.random.normal(kd, (C, 1, 3, 3), jnp.float32)   # depthwise, groups=C
    w_pw = 0.3 * jax.random.normal(kp, (O, C, 1, 1), jnp.float32)   # pointwise 1x1
    gamma = 1.0 + 0.1 * jnp.arange(O, dtype=jnp.float32)            # BN weight
    beta = 0.05 * jnp.arange(O, dtype=jnp.float32)                  # BN bias

    out = depthwise_separable_conv(x, w_dw, w_pw, gamma, beta, use_residual=True)
    out = jax.block_until_ready(out)

    ref = reference(x, w_dw, w_pw, gamma, beta, use_residual=True)
    assert out.shape == (N, O, H, W)
    assert jnp.allclose(out, ref, atol=1e-4, rtol=1e-4)
    print("KERNEL_OK")
</pallas_src>

<mosaic_0001>
module attributes {stable_mosaic.version = 11 : i64} {
  func.func @stats_kernel(%arg0: i32, %arg1: memref<1x4x256xf32, #tpu.memory_space<vmem>>, %arg2: memref<9x4x1xf32, #tpu.memory_space<vmem>>, %arg3: memref<4x4xf32, #tpu.memory_space<vmem>>, %arg4: memref<1x4x1xf32, #tpu.memory_space<vmem>>, %arg5: memref<1x4x1xf32, #tpu.memory_space<vmem>>, %arg6: memref<4x512xf32, #tpu.memory_space<vmem>>) attributes {dimension_semantics = [#tpu.dimension_semantics<parallel>], iteration_bounds = array<i64: 2>, scalar_prefetch = 0 : i64, scratch_operands = 1 : i64, tpu.core_type = #tpu.core_type<tc>, window_params = [{transform_indices = @transform_0, window_bounds = array<i64: 1, 4, 256>}, {pipeline_mode = #tpu.pipeline_mode<synchronous>, transform_indices = @transform_1, window_bounds = array<i64: 9, 4, 1>}, {pipeline_mode = #tpu.pipeline_mode<synchronous>, transform_indices = @transform_2, window_bounds = array<i64: 4, 4>}, {transform_indices = @transform_3, window_bounds = array<i64: 1, 4, 1>}, {transform_indices = @transform_4, window_bounds = array<i64: 1, 4, 1>}]} {
    %c0 = arith.constant 0 : index
    %c0_0 = arith.constant 0 : index
    %c0_1 = arith.constant 0 : index
    %0 = vector.load %arg1[%c0, %c0_0, %c0_1] : memref<1x4x256xf32, #tpu.memory_space<vmem>>, vector<1x4x256xf32>
    %1 = vector.shape_cast %0 : vector<1x4x256xf32> to vector<4x256xf32>
    %c0_2 = arith.constant 0 : index
    %c0_3 = arith.constant 0 : index
    %c0_4 = arith.constant 0 : index
    %2 = vector.load %arg2[%c0_2, %c0_3, %c0_4] : memref<9x4x1xf32, #tpu.memory_space<vmem>>, vector<9x4x1xf32>
    %c0_5 = arith.constant 0 : index
    %c0_6 = arith.constant 0 : index
    %3 = vector.load %arg3[%c0_5, %c0_6] : memref<4x4xf32, #tpu.memory_space<vmem>>, vector<4x4xf32>
    %cst = arith.constant 0.000000e+00 : f32
    %4 = vector.broadcast %cst : f32 to vector<4x512xf32>
    %c0_7 = arith.constant 0 : index
    %c0_8 = arith.constant 0 : index
    %5 = vector.load %arg6[%c0_7, %c0_8] : memref<4x512xf32, #tpu.memory_space<vmem>>, vector<4x512xf32>
    tpu.vector_store %arg6[%c0_7, %c0_8], %4 {strides = array<i32>} : memref<4x512xf32, #tpu.memory_space<vmem>>, vector<4x512xf32>,
    %c0_9 = arith.constant 0 : index
    %c128 = arith.constant 128 : index
    %6 = vector.load %arg6[%c0_9, %c128] : memref<4x512xf32, #tpu.memory_space<vmem>>, vector<4x256xf32>
    tpu.vector_store %arg6[%c0_9, %c128], %1 {strides = array<i32>} : memref<4x512xf32, #tpu.memory_space<vmem>>, vector<4x256xf32>,
    %7 = tpu.iota {dimensions = array<i32: 1>} : vector<1x256xi32>
    %c16_i32 = arith.constant 16 : i32
    %c0_i32 = arith.constant 0 : i32
    %8 = arith.cmpi eq, %c16_i32, %c0_i32 : i32
    %c1_i32 = arith.constant 1 : i32
    %9 = arith.select %8, %c1_i32, %c16_i32 : i32
    %10 = vector.broadcast %9 : i32 to vector<1x256xi32>
    %11 = arith.remsi %7, %10 : vector<1x256xi32>
    %c0_i32_10 = arith.constant 0 : i32
    %12 = vector.broadcast %c0_i32_10 : i32 to vector<1x256xi32>
    %13 = arith.cmpi ne, %11, %12 : vector<1x256xi32>
    %c0_i32_11 = arith.constant 0 : i32
    %14 = vector.broadcast %c0_i32_11 : i32 to vector<1x256xi32>
    %15 = arith.cmpi slt, %11, %14 : vector<1x256xi32>
    %c0_i32_12 = arith.constant 0 : i32
    %16 = arith.cmpi slt, %9, %c0_i32_12 : i32
    %17 = vector.broadcast %16 : i1 to vector<1x256xi1>
    %18 = vector.broadcast %17 : vector<1x256xi1> to vector<1x256xi1>
    %19 = arith.xori %15, %18 : vector<1x256xi1>
    %20 = arith.andi %19, %13 : vector<1x256xi1>
    %21 = vector.broadcast %9 : i32 to vector<1x256xi32>
    %22 = arith.addi %11, %21 : vector<1x256xi32>
    %23 = arith.select %20, %22, %11 : vector<1x256xi1>, vector<1x256xi32>
    %c1_i32_13 = arith.constant 1 : i32
    %24 = vector.broadcast %c1_i32_13 : i32 to vector<1x256xi32>
    %25 = arith.cmpi sge, %23, %24 : vector<1x256xi32>
    %c14_i32 = arith.constant 14 : i32
    %26 = vector.broadcast %c14_i32 : i32 to vector<1x256xi32>
    %27 = arith.cmpi sle, %23, %26 : vector<1x256xi32>
    %c0_14 = arith.constant 0 : index
    %c111 = arith.constant 111 : index
    %28 = vector.load %arg6[%c0_14, %c111] : memref<4x512xf32, #tpu.memory_space<vmem>>, vector<4x256xf32>
    %cst_15 = arith.constant 0.000000e+00 : f32
    %29 = vector.shape_cast %25 : vector<1x256xi1> to vector<1x256xi1>
    %30 = vector.broadcast %29 : vector<1x256xi1> to vector<4x256xi1>
    %31 = vector.broadcast %cst_15 : f32 to vector<4x256xf32>
    %32 = arith.select %30, %28, %31 : vector<4x256xi1>, vector<4x256xf32>
    %33 = vector.extract_strided_slice %2 {offsets = [0, 0, 0], sizes = [1, 4, 1], strides = [1, 1, 1]} : vector<9x4x1xf32> to vector<1x4x1xf32>
    %34 = vector.shape_cast %33 : vector<1x4x1xf32> to vector<4x1xf32>
    %35 = vector.broadcast %34 : vector<4x1xf32> to vector<4x256xf32>
    %36 = arith.mulf %32, %35 : vector<4x256xf32>
    %c0_16 = arith.constant 0 : index
    %c112 = arith.constant 112 : index
    %37 = vector.load %arg6[%c0_16, %c112] : memref<4x512xf32, #tpu.memory_space<vmem>>, vector<4x256xf32>
    %38 = vector.extract_strided_slice %2 {offsets = [1, 0, 0], sizes = [1, 4, 1], strides = [1, 1, 1]} : vector<9x4x1xf32> to vector<1x4x1xf32>
    %39 = vector.shape_cast %38 : vector<1x4x1xf32> to vector<4x1xf32>
    %40 = vector.broadcast %39 : vector<4x1xf32> to vector<4x256xf32>
    %41 = arith.mulf %37, %40 : vector<4x256xf32>
    %42 = arith.addf %36, %41 : vector<4x256xf32>
    %c0_17 = arith.constant 0 : index
    %c113 = arith.constant 113 : index
    %43 = vector.load %arg6[%c0_17, %c113] : memref<4x512xf32, #tpu.memory_space<vmem>>, vector<4x256xf32>
    %cst_18 = arith.constant 0.000000e+00 : f32
    %44 = vector.shape_cast %27 : vector<1x256xi1> to vector<1x256xi1>
    %45 = vector.broadcast %44 : vector<1x256xi1> to vector<4x256xi1>
    %46 = vector.broadcast %cst_18 : f32 to vector<4x256xf32>
    %47 = arith.select %45, %43, %46 : vector<4x256xi1>, vector<4x256xf32>
    %48 = vector.extract_strided_slice %2 {offsets = [2, 0, 0], sizes = [1, 4, 1], strides = [1, 1, 1]} : vector<9x4x1xf32> to vector<1x4x1xf32>
    %49 = vector.shape_cast %48 : vector<1x4x1xf32> to vector<4x1xf32>
    %50 = vector.broadcast %49 : vector<4x1xf32> to vector<4x256xf32>
    %51 = arith.mulf %47, %50 : vector<4x256xf32>
    %52 = arith.addf %42, %51 : vector<4x256xf32>
    %c0_19 = arith.constant 0 : index
    %c127 = arith.constant 127 : index
    %53 = vector.load %arg6[%c0_19, %c127] : memref<4x512xf32, #tpu.memory_space<vmem>>, vector<4x256xf32>
    %cst_20 = arith.constant 0.000000e+00 : f32
    %54 = vector.shape_cast %25 : vector<1x256xi1> to vector<1x256xi1>
    %55 = vector.broadcast %54 : vector<1x256xi1> to vector<4x256xi1>
    %56 = vector.broadcast %cst_20 : f32 to vector<4x256xf32>
    %57 = arith.select %55, %53, %56 : vector<4x256xi1>, vector<4x256xf32>
    %58 = vector.extract_strided_slice %2 {offsets = [3, 0, 0], sizes = [1, 4, 1], strides = [1, 1, 1]} : vector<9x4x1xf32> to vector<1x4x1xf32>
    %59 = vector.shape_cast %58 : vector<1x4x1xf32> to vector<4x1xf32>
    %60 = vector.broadcast %59 : vector<4x1xf32> to vector<4x256xf32>
    %61 = arith.mulf %57, %60 : vector<4x256xf32>
    %62 = arith.addf %52, %61 : vector<4x256xf32>
    %c0_21 = arith.constant 0 : index
    %c128_22 = arith.constant 128 : index
    %63 = vector.load %arg6[%c0_21, %c128_22] : memref<4x512xf32, #tpu.memory_space<vmem>>, vector<4x256xf32>
    %64 = vector.extract_strided_slice %2 {offsets = [4, 0, 0], sizes = [1, 4, 1], strides = [1, 1, 1]} : vector<9x4x1xf32> to vector<1x4x1xf32>
    %65 = vector.shape_cast %64 : vector<1x4x1xf32> to vector<4x1xf32>
    %66 = vector.broadcast %65 : vector<4x1xf32> to vector<4x256xf32>
    %67 = arith.mulf %63, %66 : vector<4x256xf32>
    %68 = arith.addf %62, %67 : vector<4x256xf32>
    %c0_23 = arith.constant 0 : index
    %c129 = arith.constant 129 : index
    %69 = vector.load %arg6[%c0_23, %c129] : memref<4x512xf32, #tpu.memory_space<vmem>>, vector<4x256xf32>
    %cst_24 = arith.constant 0.000000e+00 : f32
    %70 = vector.shape_cast %27 : vector<1x256xi1> to vector<1x256xi1>
    %71 = vector.broadcast %70 : vector<1x256xi1> to vector<4x256xi1>
    %72 = vector.broadcast %cst_24 : f32 to vector<4x256xf32>
    %73 = arith.select %71, %69, %72 : vector<4x256xi1>, vector<4x256xf32>
    %74 = vector.extract_strided_slice %2 {offsets = [5, 0, 0], sizes = [1, 4, 1], strides = [1, 1, 1]} : vector<9x4x1xf32> to vector<1x4x1xf32>
    %75 = vector.shape_cast %74 : vector<1x4x1xf32> to vector<4x1xf32>
    %76 = vector.broadcast %75 : vector<4x1xf32> to vector<4x256xf32>
    %77 = arith.mulf %73, %76 : vector<4x256xf32>
    %78 = arith.addf %68, %77 : vector<4x256xf32>
    %c0_25 = arith.constant 0 : index
    %c143 = arith.constant 143 : index
    %79 = vector.load %arg6[%c0_25, %c143] : memref<4x512xf32, #tpu.memory_space<vmem>>, vector<4x256xf32>
    %cst_26 = arith.constant 0.000000e+00 : f32
    %80 = vector.shape_cast %25 : vector<1x256xi1> to vector<1x256xi1>
    %81 = vector.broadcast %80 : vector<1x256xi1> to vector<4x256xi1>
    %82 = vector.broadcast %cst_26 : f32 to vector<4x256xf32>
    %83 = arith.select %81, %79, %82 : vector<4x256xi1>, vector<4x256xf32>
    %84 = vector.extract_strided_slice %2 {offsets = [6, 0, 0], sizes = [1, 4, 1], strides = [1, 1, 1]} : vector<9x4x1xf32> to vector<1x4x1xf32>
    %85 = vector.shape_cast %84 : vector<1x4x1xf32> to vector<4x1xf32>
    %86 = vector.broadcast %85 : vector<4x1xf32> to vector<4x256xf32>
    %87 = arith.mulf %83, %86 : vector<4x256xf32>
    %88 = arith.addf %78, %87 : vector<4x256xf32>
    %c0_27 = arith.constant 0 : index
    %c144 = arith.constant 144 : index
    %89 = vector.load %arg6[%c0_27, %c144] : memref<4x512xf32, #tpu.memory_space<vmem>>, vector<4x256xf32>
    %90 = vector.extract_strided_slice %2 {offsets = [7, 0, 0], sizes = [1, 4, 1], strides = [1, 1, 1]} : vector<9x4x1xf32> to vector<1x4x1xf32>
    %91 = vector.shape_cast %90 : vector<1x4x1xf32> to vector<4x1xf32>
    %92 = vector.broadcast %91 : vector<4x1xf32> to vector<4x256xf32>
    %93 = arith.mulf %89, %92 : vector<4x256xf32>
    %94 = arith.addf %88, %93 : vector<4x256xf32>
    %c0_28 = arith.constant 0 : index
    %c145 = arith.constant 145 : index
    %95 = vector.load %arg6[%c0_28, %c145] : memref<4x512xf32, #tpu.memory_space<vmem>>, vector<4x256xf32>
    %cst_29 = arith.constant 0.000000e+00 : f32
    %96 = vector.shape_cast %27 : vector<1x256xi1> to vector<1x256xi1>
    %97 = vector.broadcast %96 : vector<1x256xi1> to vector<4x256xi1>
    %98 = vector.broadcast %cst_29 : f32 to vector<4x256xf32>
    %99 = arith.select %97, %95, %98 : vector<4x256xi1>, vector<4x256xf32>
    %100 = vector.extract_strided_slice %2 {offsets = [8, 0, 0], sizes = [1, 4, 1], strides = [1, 1, 1]} : vector<9x4x1xf32> to vector<1x4x1xf32>
    %101 = vector.shape_cast %100 : vector<1x4x1xf32> to vector<4x1xf32>
    %102 = vector.broadcast %101 : vector<4x1xf32> to vector<4x256xf32>
    %103 = arith.mulf %99, %102 : vector<4x256xf32>
    %104 = arith.addf %94, %103 : vector<4x256xf32>
    %105 = vector.extract_strided_slice %3 {offsets = [0, 0], sizes = [4, 1], strides = [1, 1]} : vector<4x4xf32> to vector<4x1xf32>
    %106 = vector.extract_strided_slice %104 {offsets = [0, 0], sizes = [1, 256], strides = [1, 1]} : vector<4x256xf32> to vector<1x256xf32>
    %107 = vector.broadcast %105 : vector<4x1xf32> to vector<4x256xf32>
    %108 = vector.broadcast %106 : vector<1x256xf32> to vector<4x256xf32>
    %109 = arith.mulf %107, %108 : vector<4x256xf32>
    %110 = vector.extract_strided_slice %3 {offsets = [0, 1], sizes = [4, 1], strides = [1, 1]} : vector<4x4xf32> to vector<4x1xf32>
    %111 = vector.extract_strided_slice %104 {offsets = [1, 0], sizes = [1, 256], strides = [1, 1]} : vector<4x256xf32> to vector<1x256xf32>
    %112 = vector.broadcast %110 : vector<4x1xf32> to vector<4x256xf32>
    %113 = vector.broadcast %111 : vector<1x256xf32> to vector<4x256xf32>
    %114 = arith.mulf %112, %113 : vector<4x256xf32>
    %115 = arith.addf %109, %114 : vector<4x256xf32>
    %116 = vector.extract_strided_slice %3 {offsets = [0, 2], sizes = [4, 1], strides = [1, 1]} : vector<4x4xf32> to vector<4x1xf32>
    %117 = vector.extract_strided_slice %104 {offsets = [2, 0], sizes = [1, 256], strides = [1, 1]} : vector<4x256xf32> to vector<1x256xf32>
    %118 = vector.broadcast %116 : vector<4x1xf32> to vector<4x256xf32>
    %119 = vector.broadcast %117 : vector<1x256xf32> to vector<4x256xf32>
    %120 = arith.mulf %118, %119 : vector<4x256xf32>
    %121 = arith.addf %115, %120 : vector<4x256xf32>
    %122 = vector.extract_strided_slice %3 {offsets = [0, 3], sizes = [4, 1], strides = [1, 1]} : vector<4x4xf32> to vector<4x1xf32>
    %123 = vector.extract_strided_slice %104 {offsets = [3, 0], sizes = [1, 256], strides = [1, 1]} : vector<4x256xf32> to vector<1x256xf32>
    %124 = vector.broadcast %122 : vector<4x1xf32> to vector<4x256xf32>
    %125 = vector.broadcast %123 : vector<1x256xf32> to vector<4x256xf32>
    %126 = arith.mulf %124, %125 : vector<4x256xf32>
    %127 = arith.addf %121, %126 : vector<4x256xf32>
    %cst_30 = arith.constant dense<0.000000e+00> : vector<4xf32>
    %128 = vector.multi_reduction <add>, %127, %cst_30 [1] : vector<4x256xf32> to vector<4xf32>
    %129 = vector.shape_cast %128 : vector<4xf32> to vector<4x1xf32>
    %c0_31 = arith.constant 0 : index
    %c0_32 = arith.constant 0 : index
    %c0_33 = arith.constant 0 : index
    %130 = vector.load %arg4[%c0_31, %c0_32, %c0_33] : memref<1x4x1xf32, #tpu.memory_space<vmem>>, vector<1x4x1xf32>
    %131 = vector.shape_cast %130 : vector<1x4x1xf32> to vector<4x1xf32>
    %132 = vector.shape_cast %129 : vector<4x1xf32> to vector<1x4x1xf32>
    tpu.vector_store %arg4[%c0_31, %c0_32, %c0_33], %132 {strides = array<i32>} : memref<1x4x1xf32, #tpu.memory_space<vmem>>, vector<1x4x1xf32>,
    %133 = arith.mulf %127, %127 : vector<4x256xf32>
    %cst_34 = arith.constant dense<0.000000e+00> : vector<4xf32>
    %134 = vector.multi_reduction <add>, %133, %cst_34 [1] : vector<4x256xf32> to vector<4xf32>
    %135 = vector.shape_cast %134 : vector<4xf32> to vector<4x1xf32>
    %c0_35 = arith.constant 0 : index
    %c0_36 = arith.constant 0 : index
    %c0_37 = arith.constant 0 : index
    %136 = vector.load %arg5[%c0_35, %c0_36, %c0_37] : memref<1x4x1xf32, #tpu.memory_space<vmem>>, vector<1x4x1xf32>
    %137 = vector.shape_cast %136 : vector<1x4x1xf32> to vector<4x1xf32>
    %138 = vector.shape_cast %135 : vector<4x1xf32> to vector<1x4x1xf32>
    tpu.vector_store %arg5[%c0_35, %c0_36, %c0_37], %138 {strides = array<i32>} : memref<1x4x1xf32, #tpu.memory_space<vmem>>, vector<1x4x1xf32>,
    return
  }
  func.func @transform_0(%arg0: i32) -> (i32, i32, i32) {
    %c0_i32 = arith.constant 0 : i32
    %c0_i32_0 = arith.constant 0 : i32
    %c0_i32_1 = arith.constant 0 : i32
    return %arg0, %c0_i32, %c0_i32_0 : i32, i32, i32
  }
  func.func @transform_1(%arg0: i32) -> (i32, i32, i32) {
    %c0_i32 = arith.constant 0 : i32
    %c0_i32_0 = arith.constant 0 : i32
    %c0_i32_1 = arith.constant 0 : i32
    %c0_i32_2 = arith.constant 0 : i32
    return %c0_i32, %c0_i32_0, %c0_i32_1 : i32, i32, i32
  }
  func.func @transform_2(%arg0: i32) -> (i32, i32) {
    %c0_i32 = arith.constant 0 : i32
    %c0_i32_0 = arith.constant 0 : i32
    %c0_i32_1 = arith.constant 0 : i32
    return %c0_i32, %c0_i32_0 : i32, i32
  }
  func.func @transform_3(%arg0: i32) -> (i32, i32, i32) {
    %c0_i32 = arith.constant 0 : i32
    %c0_i32_0 = arith.constant 0 : i32
    %c0_i32_1 = arith.constant 0 : i32
    return %arg0, %c0_i32, %c0_i32_0 : i32, i32, i32
  }
  func.func @transform_4(%arg0: i32) -> (i32, i32, i32) {
    %c0_i32 = arith.constant 0 : i32
    %c0_i32_0 = arith.constant 0 : i32
    %c0_i32_1 = arith.constant 0 : i32
    return %arg0, %c0_i32, %c0_i32_0 : i32, i32, i32
  }
}

</mosaic_0001>

<bundles_post_ra>
// kernel: tpu_custom_call.1
= control target key start
LH: loop header
LB: loop body
LE: loop exit
PB: predicated region body
PF: predicated region fallthrough
CT: control target
= control target key end

     0   :  { %s755_s15 = smov 0   ;;  %s898_s0 = inlined_call_operand.vmem [shape: f32[2,4,256], index: 0, kind: input, shape index: {}]   ;;  %s899_s1 = inlined_call_operand.vmem [shape: f32[9,4,1], index: 1, kind: input, shape index: {}]   ;;  %s900_s2 = inlined_call_operand.vmem [shape: f32[4,4], index: 2, kind: input, shape index: {}]   ;;  %s901_s3 = inlined_call_operand.vmem [shape: f32[2,4,1], index: 3, kind: output, shape index: {0}]   ;;  %s902_s4 = inlined_call_operand.vmem [shape: f32[2,4,1], index: 4, kind: output, shape index: {1}]  }
   0x1 LB: > { %s666_s16 = sadd.s32 4294967295, %s714_s15   ;;  %p670_p0 = scmp.ge.s32.totalorder %s714_s15, 1  ;;  %s714_s15 = sphi %s755_s15, %s15_s15  }
   0x2   : > { %p165_p1 = scmp.lt.s32.totalorder %s714_s15, 3 }
   0x4   : > { %p166_p2 = pnand %p670_p0, %p165_p1 }
   0x5   : > { %v209_v0 = vld [vmem:[%s899_s1 + $0x4] sm:$0xf] (!%p166_p2)  ;;  %p194_p3 = scmp.lt.s32.totalorder (!%p166_p2), %s666_s16, 1  ;;  %v716_v1 = vmov (!%p166_p2), 0   ;;  %v208_v2 = vld [vmem:[%s899_s1] sm:$0xf] (!%p166_p2)  ;;  %v221_v22 = vlaneseq (!%p166_p2) }
   0x6   : > { %169 = sbr.rel (%p166_p2) target bundleno = 445 (0x1bd), region = 32  ;;  %700 = vset.pattern.permute.xlu0 (!%p166_p2), %v716_v1  ;;  %701 = vset.pattern.permute.xlu1 (!%p166_p2), %v716_v1  ;;  %v215_v3 = vld [vmem:[%s899_s1 + $0x1c] sm:$0xf] (!%p166_p2)  ;;  %v210_v4 = vld [vmem:[%s899_s1 + $0x8] sm:$0xf] (!%p166_p2)  ;;  %v717_v5 = vmov (!%p166_p2), 0.0  }
   0x7   : > { %285 = vperm.xlu0 (!%p166_p2), %700, %v209_v0   ;;  %276 = vperm.xlu1 (!%p166_p2), %701, %v208_v2   ;;  %218 = vst [vmem:[#allocation2] sm:$0xff] (!%p166_p2), %v717_v5  ;;  %219 = vst [vmem:[#allocation2 + $0x8] sm:$0xff] (!%p166_p2), %v717_v5  ;;  %v212_v7 = vld [vmem:[%s899_s1 + $0x10] sm:$0xf] (!%p166_p2)  ;;  %v211_v8 = vld [vmem:[%s899_s1 + $0xc] sm:$0xf] (!%p166_p2) }
   0x8   : > { %s718_s7 = smov (!%p166_p2), 15   ;;  %s719_s8 = smov (!%p166_p2), 17   ;;  %v720_v13 = vmov (!%p166_p2), 1   ;;  %v213_v14 = vld [vmem:[%s899_s1 + $0x14] sm:$0xf] (!%p166_p2)  ;;  %v804_v26 = vshrl.u32 (!%p166_p2), %v221_v22, 7 }
   0x9   : > { %s721_s11 = smov (!%p166_p2), 1   ;;  %v214_v16 = vld [vmem:[%s899_s1 + $0x18] sm:$0xf] (!%p166_p2)  ;;  %s722_s14 = smov (!%p166_p2), 127   ;;  %v216_v19 = vld [vmem:[%s899_s1 + $0x20] sm:$0xf] (!%p166_p2) }
   0xa   : > { %s723_s19 = smov (!%p166_p2), 113   ;;  %s724_s20 = smov (!%p166_p2), 111   ;;  %v725_v23 = vmov (!%p166_p2), 839922192   ;;  %v217_v36 = vld [vmem:[%s900_s2] sm:$0xf] (!%p166_p2) }
   0xb   : > { %448 = vperm.xlu0 (!%p166_p2), %700, %v215_v3   ;;  %337 = vperm.xlu1 (!%p166_p2), %701, %v210_v4   ;;  %v288_v24 = vunpack.c.l.s4 (!%p166_p2), %v725_v23  ;;  %s726_s21 = smov (!%p166_p2), 16   ;;  %s727_s24 = smov (!%p166_p2), 112   ;;  %v728_v40 = vmov (!%p166_p2), 2   ;;  %v729_v42 = vmov (!%p166_p2), 3   ;;  %v222_v63 = vand.u32 (!%p166_p2), 127, %v221_v22 }
   0xc   : > { %vm267_vm0 = vcmask (!%p166_p2), 138240   ;;  %vm328_vm1 = vcmask (!%p166_p2), 121856   ;;  %vm355_vm3 = vcmask (!%p166_p2), 7168   ;;  %vm306_vm7 = vcmask (!%p166_p2), 130048  }
   0xd   : > { %s912_s16 = smov (!%p194_p3, %s666_s16), 1  ;;  %v289_v25 = vunpack.c.0.s8 %v288_v24  ;;  %v223_v1 = vadd.s32 128, %v222_v63  ;;  %v228_v3 = vand.u32 15, %v222_v63  ;;  %vm401_vm8 = vcmask 1039360  }
   0xe   : > { %s677_s25 = sshll.u32 %s912_s16, 3  ;;  %v391_v18 = vld [vmem:[#allocation2 + $0xc] sm:$0xf]  ;;  %vm428_vm9 = vcmask 924672   ;;  %vm487_vm10 = vcmask 908288   ;;  %vm469_vm11 = vcmask 916480  }
   0xf   : > { %s198_s28 = scalar_lea.vmem %s898_s0, %s677_s25  ;;  %374 = vperm.xlu0 %700, %v212_v7   ;;  %364 = vperm.xlu1 %701, %v211_v8   ;;  %v418_v20 = vld [vmem:[#allocation2 + $0xc] sm:$0xf]  ;;  %v807_v27 = vsub.s32 %v289_v25, %v804_v26  ;;  %v235_v5 = vand.u32 15, %v223_v1  ;;  %vm825_vm2 = vcmp.ge.s32.totalorder %v228_v3, 1  ;;  %vm829_vm4 = vcmp.le.s32.totalorder %v228_v3, 14  ;;  %s673_s25 = sshll.u32 %s912_s16, 2 }
  0x10   : > { %v781_v6 = vld [vmem:[%s198_s28] sm:$0xff]  ;;  %v477_v21 = vld [vmem:[#allocation2 + $0xc] sm:$0xf]  ;;  %vm566_vm12 = vcmask 1043456   ;;  %s202_s28 = scalar_lea.vmem %s901_s3, %s673_s25  ;;  %vm572_vm13 = vcmask 3072   ;;  %s206_s5 = scalar_lea.vmem %s902_s4, %s673_s25 }
  0x11   : > { %220 = vst [vmem:[#allocation2 + $0x4] sm:$0xff] %v781_v6  ;;  %v394_v17 = vcombine.high %v781_v6, %v781_v6  ;;  %v445_v38 = vld [vmem:[#allocation2 + $0xc] sm:$0xf]  ;;  %vm833_vm5 = vcmp.ge.s32.totalorder %v235_v5, 1  ;;  %vm837_vm6 = vcmp.le.s32.totalorder %v235_v5, 14 }
  0x13   : > { %702 = vset.pattern.permute.xlu0 %v720_v13 }
  0x18   : > { %v313_v9 = vld [vmem:[#allocation2] sm:$0xff]  ;;  %v253_v11 = vld [vmem:[#allocation2 + $0x8] sm:$0xf] }
  0x19   : > { %322 = vrot.lane.b32.xlu1 %v313_v9, %s718_s7  ;;  %v321_v10 = vcombine.high %v313_v9, %v313_v9  ;;  %261 = vrot.lane.b32.xlu0 %v313_v9, %s719_s8  ;;  %v314_v12 = vld [vmem:[#allocation2 + $0x8] sm:$0xf] }
  0x1a   : > { %v345_v15 = vld [vmem:[#allocation2 + $0x8] sm:$0xf] }
  0x1b   : > { %v282_v31 = vld [vmem:[#allocation2 + $0x8] sm:$0xf] }
  0x1d   : > { %263 = vrot.lane.b32.xlu1 %v321_v10, %s719_s8  ;;  %265 = vrot.lane.b32.xlu0 %v253_v11, %s719_s8 }
  0x21   : > { %326 = vrot.lane.b32.xlu1 %v314_v12, %s718_s7  ;;  %324 = vrot.lane.b32.xlu0 %v321_v10, %s718_s7 }
  0x25   : > { %410 = vperm.xlu1 %701, %v213_v14   ;;  %349 = vrot.lane.b32.xlu0 %v313_v9, %s721_s11 }
  0x29   : > { %351 = vrot.lane.b32.xlu1 %v321_v10, %s721_s11  ;;  %353 = vrot.lane.b32.xlu0 %v345_v15, %s721_s11  ;;  %v540_v10 = vsub.s32 2, %v804_v26 }
  0x2d   : > { %437 = vperm.xlu1 %701, %v214_v16   ;;  %395 = vrot.lane.b32.xlu0 %v781_v6, %s722_s14 }
  0x31   : > { %397 = vrot.lane.b32.xlu1 %v394_v17, %s722_s14  ;;  %399 = vrot.lane.b32.xlu0 %v391_v18, %s722_s14 }
  0x35   : > { %496 = vperm.xlu1 %701, %v216_v19   ;;  %422 = vrot.lane.b32.xlu0 %v781_v6, %s723_s19 }
  0x39   : > { %424 = vrot.lane.b32.xlu1 %v394_v17, %s723_s19  ;;  %426 = vrot.lane.b32.xlu0 %v418_v20, %s723_s19 }
  0x3d   : > { %481 = vrot.lane.b32.xlu1 %v781_v6, %s724_s20  ;;  %483 = vrot.lane.b32.xlu0 %v394_v17, %s724_s20 }
  0x41   : > { %485 = vrot.lane.b32.xlu1 %v477_v21, %s724_s20 }
  0x86   : > { %v286_v28 = vpop.permute.xlu0 %285  ;;  %v277_v43 = vpop.permute.xlu1 %276 }
  0x87   : > { %v293_v29 = vrot.slane %v286_v28, %v807_v27 }
  0x89   : > { %v295_v30 = vmul.f32 %v313_v9, %v293_v29  ;;  %v296_v34 = vmul.f32 %v293_v29, %v282_v31 }
  0x8a   : > { %v449_v32 = vpop.permute.xlu0 %448  ;;  %v338_v44 = vpop.permute.xlu1 %337 }
  0x8b   : > { %300 = vrot.lane.b32.xlu0 %v295_v30, %s726_s21  ;;  %v299_v33 = vcombine.high %v295_v30, %v295_v30  ;;  %v456_v35 = vrot.slane %v449_v32, %v807_v27 }
  0x8d   : > { %302 = vrot.lane.b32.xlu1 %v299_v33, %s726_s21  ;;  %v458_v37 = vmul.f32 %v456_v35, %v781_v6  ;;  %v459_v39 = vmul.f32 %v456_v35, %v445_v38 }
  0x8e   : > { %v815_v45 = vpop.permute.xlu1 %364  ;;  %v375_v46 = vpop.permute.xlu0 %374 }
  0x8f   : > { %304 = vrot.lane.b32.xlu0 %v296_v34, %s726_s21  ;;  %v462_v41 = vcombine.high %v458_v37, %v458_v37  ;;  %v382_v16 = vrot.slane %v375_v46, %v807_v27 }
  0x91   : > { %505 = vperm.xlu1 %701, %v217_v36   ;;  %v384_v29 = vmul.f32 %v382_v16, %v781_v6 }
  0x92   : > { %v323_v47 = vpop.permute.xlu1 %322  ;;  %v262_v48 = vpop.permute.xlu0 %261 }
  0x93   : > { %463 = vrot.lane.b32.xlu0 %v458_v37, %s727_s24 }
  0x95   : > { %703 = vset.pattern.permute.xlu1 %v728_v40 }
  0x96   : > { %535 = vperm.xlu1 %703, %v217_v36   ;;  %v264_v49 = vpop.permute.xlu1 %263  ;;  %v266_v50 = vpop.permute.xlu0 %265 }
  0x97   : > { %467 = vrot.lane.b32.xlu0 %v459_v39, %s727_s24  ;;  %v268_v8 = vsel %vm267_vm0, %v262_v48, %v264_v49  ;;  %v269_v12 = vsel %vm267_vm0, %v264_v49, %v266_v50 }
  0x98   : > { %v272_v17 = vsel %vm825_vm2, %v268_v8, 0.0  ;;  %v273_v21 = vsel %vm833_vm5, %v269_v12, 0.0 }
  0x99   : > { %v279_v23 = vmul.f32 %v277_v43, %v272_v17  ;;  %v280_v31 = vmul.f32 %v277_v43, %v273_v21  ;;  %v510_v17 = vsub.s32 0, %v804_v26 }
  0x9a   : > { %465 = vrot.lane.b32.xlu1 %v462_v41, %s727_s24  ;;  %v327_v51 = vpop.permute.xlu1 %326  ;;  %v325_v52 = vpop.permute.xlu0 %324 }
  0x9b   : > { %704 = vset.pattern.permute.xlu1 %v729_v42  ;;  %519 = vperm.xlu0 %702, %v217_v36   ;;  %v329_v14 = vsel %vm328_vm1, %v323_v47, %v325_v52  ;;  %v330_v18 = vsel %vm328_vm1, %v325_v52, %v327_v51  ;;  %v386_v51 = vcombine.high %v384_v29, %v384_v29 }
  0x9c   : > { %v333_v22 = vsel %vm829_vm4, %v329_v14, 0.0  ;;  %v334_v24 = vsel %vm837_vm6, %v330_v18, 0.0  ;;  %v524_v18 = vsub.s32 1, %v804_v26 }
  0x9d   : > { %v340_v32 = vmul.f32 %v338_v44, %v333_v22 }
  0x9e   : > { %551 = vperm.xlu1 %704, %v217_v36   ;;  %v350_v54 = vpop.permute.xlu0 %349  ;;  %v341_v36 = vmul.f32 %v338_v44, %v334_v24 }
  0x9f   : > { %705 = vset.pattern.permute.xlu0 %v729_v42 }
  0xa2   : > { %v354_v56 = vpop.permute.xlu0 %353 }
  0xa4   : > { %v817_v53 = vpop.permute.xlu1 %410 }
  0xa6   : > { %v396_v58 = vpop.permute.xlu0 %395 }
  0xa8   : > { %v352_v55 = vpop.permute.xlu1 %351 }
  0xa9   : > { %v356_v19 = vsel %vm355_vm3, %v350_v54, %v352_v55  ;;  %v357_v27 = vsel %vm355_vm3, %v352_v55, %v354_v56 }
  0xaa   : > { %v400_v60 = vpop.permute.xlu0 %399  ;;  %v360_v25 = vsel %vm825_vm2, %v356_v19, 0.0  ;;  %v361_v38 = vsel %vm833_vm5, %v357_v27, 0.0 }
  0xab   : > { %v367_v37 = vmul.f32 %v815_v45, %v360_v25  ;;  %v368_v46 = vmul.f32 %v815_v45, %v361_v38 }
  0xac   : > { %v819_v57 = vpop.permute.xlu1 %437 }
  0xae   : > { %v423_v62 = vpop.permute.xlu0 %422 }
  0xb0   : > { %v398_v59 = vpop.permute.xlu1 %397 }
  0xb1   : > { %v402_v33 = vsel %vm401_vm8, %v396_v58, %v398_v59  ;;  %v403_v40 = vsel %vm401_vm8, %v398_v59, %v400_v60 }
  0xb2   : > { %v427_v2 = vpop.permute.xlu0 %426  ;;  %v406_v43 = vsel %vm829_vm4, %v402_v33, 0.0  ;;  %v407_v49 = vsel %vm837_vm6, %v403_v40, 0.0 }
  0xb3   : > { %v413_v52 = vmul.f32 %v817_v53, %v406_v43  ;;  %v414_v45 = vmul.f32 %v817_v53, %v407_v49 }
  0xb4   : > { %v821_v61 = vpop.permute.xlu1 %496 }
  0xb6   : > { %v484_v9 = vpop.permute.xlu0 %483 }
  0xb8   : > { %v425_v0 = vpop.permute.xlu1 %424 }
  0xb9   : > { %v429_v6 = vsel %vm428_vm9, %v423_v62, %v425_v0  ;;  %v430_v44 = vsel %vm428_vm9, %v425_v0, %v427_v2 }
  0xba   : > { %v433_v50 = vsel %vm825_vm2, %v429_v6, 0.0  ;;  %v434_v56 = vsel %vm833_vm5, %v430_v44, 0.0 }
  0xbb   : > { %v440_v58 = vmul.f32 %v819_v57, %v433_v50  ;;  %v441_v62 = vmul.f32 %v819_v57, %v434_v56 }
  0xbc   : > { %v823_v4 = vpop.permute.xlu1 %481 }
  0xbd   : > { %v488_v5 = vsel %vm487_vm10, %v823_v4, %v484_v9 }
  0xbe   : > { %v492_v53 = vsel %vm829_vm4, %v488_v5, 0.0 }
  0xbf   : > { %v499_v19 = vmul.f32 %v821_v61, %v492_v53 }
  0xc0   : > { %v486_v15 = vpop.permute.xlu1 %485 }
  0xc1   : > { %v489_v7 = vsel %vm487_vm10, %v484_v9, %v486_v15 }
  0xc2   : > { %v493_v11 = vsel %vm837_vm6, %v489_v7, 0.0 }
  0xc3   : > { %v500_v4 = vmul.f32 %v821_v61, %v493_v11 }
  0xfd   : > { %v301_v20 = vpop.permute.xlu0 %300 }
  0xff   : > { %v303_v28 = vpop.permute.xlu1 %302 }
 0x100   : > { %v307_v30 = vsel %vm306_vm7, %v301_v20, %v303_v28  ;;  %v556_v20 = vsub.s32 3, %v804_v26 }
 0x101   : > { %v311_v34 = vadd.f32 %v307_v30, %v279_v23  ;;  %v305_v35 = vpop.permute.xlu0 %304 }
 0x102   : > { %v308_v39 = vsel %vm306_vm7, %v303_v28, %v305_v35 }
 0x103   : > { %v342_v41 = vadd.f32 %v340_v32, %v311_v34  ;;  %v312_v42 = vadd.f32 %v308_v39, %v280_v31 }
 0x105   : > { %v369_v47 = vadd.f32 %v367_v37, %v342_v41  ;;  %v343_v48 = vadd.f32 %v341_v36, %v312_v42  ;;  %v464_v3 = vpop.permute.xlu0 %463 }
 0x107   : > { %v370_v54 = vadd.f32 %v368_v46, %v343_v48  ;;  %v388_v55 = vadd.f32 %v384_v29, %v369_v47 }
 0x109   : > { %v389_v59 = vadd.f32 %v386_v51, %v370_v54  ;;  %v415_v60 = vadd.f32 %v413_v52, %v388_v55  ;;  %v468_v12 = vpop.permute.xlu0 %467 }
 0x10b   : > { %v416_v63 = vadd.f32 %v414_v45, %v389_v59  ;;  %v442_v0 = vadd.f32 %v440_v58, %v415_v60 }
 0x10d   : > { %v443_v1 = vadd.f32 %v441_v62, %v416_v63 }
 0x110   : > { %v506_v2 = vpop.permute.xlu1 %505 }
 0x115   : > { %v536_v8 = vpop.permute.xlu1 %535 }
 0x119   : > { %v466_v14 = vpop.permute.xlu1 %465 }
 0x11a   : > { %v470_v57 = vsel %vm469_vm11, %v464_v3, %v466_v14  ;;  %v471_v16 = vsel %vm469_vm11, %v466_v14, %v468_v12  ;;  %v520_v22 = vpop.permute.xlu0 %519 }
 0x11b   : > { %v474_v9 = vadd.f32 %v470_v57, %v442_v0  ;;  %v475_v15 = vadd.f32 %v471_v16, %v443_v1 }
 0x11d   : > { %v501_v13 = vadd.f32 %v499_v19, %v474_v9  ;;  %v502_v21 = vadd.f32 %v500_v4, %v475_v15  ;;  %v552_v35 = vpop.permute.xlu1 %551 }
 0x11f   : > { %v511_v23 = vrot.slane %v501_v13, %v510_v17  ;;  %v515_v24 = vrot.slane %v502_v21, %v510_v17  ;;  %v525_v25 = vrot.slane %v501_v13, %v524_v18  ;;  %v529_v27 = vrot.slane %v502_v21, %v524_v18 }
 0x120   : > { %v541_v28 = vrot.slane %v501_v13, %v540_v10  ;;  %v545_v29 = vrot.slane %v502_v21, %v540_v10  ;;  %v557_v30 = vrot.slane %v501_v13, %v556_v20  ;;  %v561_v31 = vrot.slane %v502_v21, %v556_v20 }
 0x121   : > { %v516_v32 = vmul.f32 %v511_v23, %v506_v2  ;;  %v517_v33 = vmul.f32 %v515_v24, %v506_v2  ;;  %v530_v61 = vmul.f32 %v525_v25, %v520_v22  ;;  %v531_v34 = vmul.f32 %v529_v27, %v520_v22 }
 0x122   : > { %v546_v38 = vmul.f32 %v541_v28, %v536_v8  ;;  %v547_v26 = vmul.f32 %v545_v29, %v536_v8  ;;  %v562_v6 = vmul.f32 %v557_v30, %v552_v35  ;;  %v563_v41 = vmul.f32 %v561_v31, %v552_v35 }
 0x123   : > { %v532_v36 = vadd.f32 %v530_v61, %v516_v32  ;;  %v533_v37 = vadd.f32 %v531_v34, %v517_v33 }
 0x125   : > { %v548_v39 = vadd.f32 %v546_v38, %v532_v36  ;;  %v549_v40 = vadd.f32 %v547_v26, %v533_v37 }
 0x127   : > { %v564_v42 = vadd.f32 %v562_v6, %v548_v39  ;;  %v565_v43 = vadd.f32 %v563_v41, %v549_v40 }
 0x129   : > { %v567_v46 = vsel %vm566_vm12, %v564_v42, 0.0  ;;  %v568_v44 = vsel %vm566_vm12, %v565_v43, 0.0  ;;  %v574_v47 = vmul.f32 %v564_v42, %v564_v42  ;;  %v575_v48 = vmul.f32 %v565_v43, %v565_v43 }
 0x12a   : > { %v569_v49 = vadd.f32 %v568_v44, %v567_v46 }
 0x12b   : > { %v576_v50 = vsel %vm566_vm12, %v574_v47, 0.0  ;;  %v577_v51 = vsel %vm566_vm12, %v575_v48, 0.0 }
 0x12c   : > { %570 = vadd.xlane.f32.xlu0 %v569_v49  ;;  %v578_v52 = vadd.f32 %v577_v51, %v576_v50 }
 0x12e   : > { %579 = vadd.xlane.f32.xlu1 %v578_v52 }
 0x1b9   : > { %v571_v54 = vpop.xlane.xlu0 %570 }
 0x1ba   : > { %573 = vst.msk [vmem:[%s202_s28] sm:$0xf] %vm572_vm13, %v571_v54 }
 0x1bb   : > { %v580_v55 = vpop.xlane.xlu1 %579 }
 0x1bc   : > { %581 = vst.msk [vmem:[%s206_s5] sm:$0xf] %vm572_vm13, %v580_v55 }
 0x1bd PF: > { %s15_s15 = sadd.s32 1, %s714_s15  }
 0x1be   : > { %p12_p4 = scmp.ge.s32.totalorder %s15_s15, 4  }
 0x1c0   :  { %14 = sbr.rel (!%p12_p4) target bundleno = 1 (0x1), region = 74 }

</bundles_post_ra>
